<compile_context>
chip_gen: v6e
topology: v6e:2x2x1
jax: 0.10.0
libtpu: 0.0.40
codegen_flags: <defaults>
</compile_context>

<pallas_src>
import functools
import math
from typing import NamedTuple, Optional

import jax
import jax.numpy as jnp
from jax.experimental import pallas as pl
from jax.experimental.pallas import tpu as pltpu


# --------------------------------------------------------------------------- #
# Kernel
# --------------------------------------------------------------------------- #
def _ffn_kernel(x_ref, w13_ref, w2_ref, o_ref, acc_ref, *, th):
    """One (row-tile i, hidden-chunk k) step of out = (silu(x@W1) * (x@W3)) @ W2.

    w13_ref holds the k-th fused chunk [W1_k | W3_k] of shape (dim_p, 2*th),
    so a single MXU dot produces both up-projections for this chunk.
    """
    k = pl.program_id(1)

    @pl.when(k == 0)
    def _init():
        acc_ref[...] = jnp.zeros_like(acc_ref)

    x = x_ref[...]
    # Fused up-projection for this hidden chunk (MXU), f32 accumulation.
    h13 = jnp.dot(x, w13_ref[...], preferred_element_type=jnp.float32)
    h1 = h13[:, :th]
    h3 = h13[:, th:]
    # SiLU gating in f32 (VPU + EUP sigmoid).
    gated = (h1 * jax.nn.sigmoid(h1)) * h3
    # Partial down-projection accumulated into the resident f32 scratch.
    acc_ref[...] += jnp.dot(gated.astype(w2_ref.dtype), w2_ref[...],
                            preferred_element_type=jnp.float32)

    @pl.when(k == pl.num_programs(1) - 1)
    def _finalize():
        o_ref[...] = acc_ref[...].astype(o_ref.dtype)


# --------------------------------------------------------------------------- #
# Tiling helpers
# --------------------------------------------------------------------------- #
def _round_up(x, m):
    return ((x + m - 1) // m) * m


def _sublane_quantum(*dtypes):
    """Minimum sublane multiple so packed-dtype tiles stay unmasked."""
    q = 8
    for dt in dtypes:
        isz = jnp.dtype(dt).itemsize
        q = max(q, 8 if isz >= 4 else (16 if isz == 2 else 32))
    return q


def _vmem_bytes(tm, th, dim_p, cbytes, obytes, wbuf):
    """VMEM footprint estimate for one (tm, th) tiling choice.

    2-deep x / out buffers, `wbuf`-deep weight buffers, f32 accumulator and
    the in-kernel f32 temporaries (h13, h1, h3, gated).
    """
    x_b = 2 * tm * dim_p * cbytes
    w13_b = wbuf * dim_p * (2 * th) * cbytes
    w2_b = wbuf * th * dim_p * cbytes
    o_b = 2 * tm * dim_p * obytes
    acc_b = tm * dim_p * 4
    tmp_b = tm * (2 * th) * 4 + 3 * tm * th * 4
    return x_b + w13_b + w2_b + o_b + acc_b + tmp_b


def _pick_th(hid_p, dim_p, tm_max, th_max, cbytes, obytes, wbuf, budget):
    """Largest multiple-of-128 divisor of hid_p that is <= th_max and fits VMEM."""
    th_hi = min(max(128, _round_up(th_max, 128)), hid_p)
    for th in range(th_hi, 127, -128):
        if hid_p % th == 0 and _vmem_bytes(tm_max, th, dim_p, cbytes, obytes,
                                           wbuf, ) <= budget:
            return th
    return 128  # always divides hid_p (hid_p is a multiple of 128)


def _pick_tm(M, tm_max, th, dim_p, cbytes, obytes, wbuf, budget, quantum):
    """Adaptive row tile: bound padding waste, then shrink to fit VMEM budget."""
    tm_max = max(quantum, _round_up(tm_max, quantum))
    n_tiles = -(-M // tm_max)
    tm = _round_up(-(-M // n_tiles), quantum)
    while tm > quantum and _vmem_bytes(tm, th, dim_p, cbytes, obytes, wbuf) > budget:
        tm = _round_up(tm // 2, quantum)
    return max(tm, quantum)


# --------------------------------------------------------------------------- #
# Weight preparation (hoisted out of the hot path)
# --------------------------------------------------------------------------- #
class FFNParams(NamedTuple):
    w13: jax.Array        # [dim_p, 2*hid_p] fused, padded, compute-dtype [W1|W3] k-chunks
    w2: jax.Array         # [hid_p, dim_p]   padded, compute-dtype W2
    dim: int
    dim_p: int
    hidden: int
    hid_p: int
    th: int
    compute_dtype: object
    tm_max: int
    vmem_budget_bytes: int
    weight_buffers: int
    min_row_tiles: int


def prepare_weights(w1, w3, w2, *, compute_dtype=jnp.bfloat16, tm_max=512,
                    th_max=512, vmem_budget_bytes=48 << 20, weight_buffers=2,
                    min_row_tiles=1, dim_align=128):
    """Pad, cast and fuse the FFN weights once (call at init, not per step).

    dim_align: 128 is always correct; 256 is marginally better on v6e/v7x when
    dim % 256 != 0 (2x256x256 MXU tiles).
    """
    dim, hidden = w1.shape
    assert w3.shape == (dim, hidden) and w2.shape == (hidden, dim)

    cbytes = jnp.dtype(compute_dtype).itemsize
    dim_p = _round_up(dim, max(128, dim_align))
    hid_p = _round_up(hidden, 128)
    th = _pick_th(hid_p, dim_p, max(16, _round_up(tm_max, 16)), th_max,
                  cbytes, 4, weight_buffers, vmem_budget_bytes)
    n_k = hid_p // th

    # Zero padding is mathematically inert: padded x columns hit zero W1/W3
    # rows, padded hidden columns give silu(0)*0 = 0, padded output columns
    # come from zero W2 columns and are sliced off.
    if (dim_p, hid_p) != (dim, hidden):
        w1 = jnp.pad(w1, ((0, dim_p - dim), (0, hid_p - hidden)))
        w3 = jnp.pad(w3, ((0, dim_p - dim), (0, hid_p - hidden)))
        w2 = jnp.pad(w2, ((0, hid_p - hidden), (0, dim_p - dim)))
    w1 = w1.astype(compute_dtype)
    w3 = w3.astype(compute_dtype)
    w2 = w2.astype(compute_dtype)

    # Interleave per-k chunks: block k of w13 is [W1 chunk k | W3 chunk k].
    w13 = jnp.concatenate(
        [w1.reshape(dim_p, n_k, th), w3.reshape(dim_p, n_k, th)], axis=2
    ).reshape(dim_p, 2 * hid_p)

    return FFNParams(w13=w13, w2=w2, dim=dim, dim_p=dim_p, hidden=hidden,
                     hid_p=hid_p, th=th, compute_dtype=compute_dtype,
                     tm_max=tm_max, vmem_budget_bytes=vmem_budget_bytes,
                     weight_buffers=weight_buffers, min_row_tiles=min_row_tiles)


def make_feed_forward(w1, w3, w2, **cfg):
    """Prepare weights once and return a callable ff(x) -> out."""
    params = prepare_weights(w1, w3, w2, **cfg)
    return functools.partial(feed_forward, params=params)


# --------------------------------------------------------------------------- #
# Forward pass
# --------------------------------------------------------------------------- #
def feed_forward(x, params: FFNParams):
    """x: [..., dim] -> [..., dim] with prepared weights."""
    p = params
    dim = x.shape[-1]
    assert dim == p.dim, f"x last dim {dim} != weight dim {p.dim}"
    M = x.size // dim

    cdt = p.compute_dtype
    cbytes = jnp.dtype(cdt).itemsize
    obytes = jnp.dtype(x.dtype).itemsize
    quantum = _sublane_quantum(x.dtype, cdt)

    tm = _pick_tm(M, p.tm_max, p.th, p.dim_p, cbytes, obytes,
                  p.weight_buffers, p.vmem_budget_bytes, quantum)
    if p.min_row_tiles > 1 and M > quantum:
        # v7x: give each TensorCore at least one row tile ("parallel" axis).
        want = max(p.min_row_tiles, -(-M // tm))
        tm = max(quantum, _round_up(-(-M // want), quantum))
    M_p = _round_up(M, tm)
    n_row = M_p // tm
    n_k = p.hid_p // p.th

    x2d = x.reshape(M, dim)
    if (M_p, p.dim_p) != (M, dim):
        x2d = jnp.pad(x2d, ((0, M_p - M), (0, p.dim_p - dim)))
    x2d = x2d.astype(cdt)

    def wspec(shape, index_map):
        if p.weight_buffers != 2:
            return pl.BlockSpec(shape, index_map,
                                pipeline_mode=pl.Buffered(p.weight_buffers))
        return pl.BlockSpec(shape, index_map)

    needed = _vmem_bytes(tm, p.th, p.dim_p, cbytes, obytes, p.weight_buffers)
    vmem_limit = int(min(needed + (8 << 20), 128 << 20))

    bytes_accessed = (M_p * p.dim_p * cbytes                       # x once
                      + n_row * (p.w13.size + p.w2.size) * cbytes  # weights re-streamed per row tile
                      + M_p * p.dim_p * obytes)                    # output once

    out2d = pl.pallas_call(
        functools.partial(_ffn_kernel, th=p.th),
        out_shape=jax.ShapeDtypeStruct((M_p, p.dim_p), x.dtype),
        grid_spec=pltpu.PrefetchScalarGridSpec(
            num_scalar_prefetch=0,
            grid=(n_row, n_k),
            in_specs=[
                pl.BlockSpec((tm, p.dim_p), lambda i, k: (i, 0)),    # x row tile (held over k)
                wspec((p.dim_p, 2 * p.th), lambda i, k: (0, k)),      # fused [W1|W3] chunk
                wspec((p.th, p.dim_p), lambda i, k: (k, 0)),          # W2 chunk
            ],
            out_specs=pl.BlockSpec((tm, p.dim_p), lambda i, k: (i, 0)),
            scratch_shapes=[pltpu.VMEM((tm, p.dim_p), jnp.float32)],  # f32 accumulator
        ),
        compiler_params=pltpu.CompilerParams(
            dimension_semantics=("parallel", "arbitrary"),
            vmem_limit_bytes=vmem_limit,
        ),
        cost_estimate=pl.CostEstimate(
            flops=6 * M_p * p.dim_p * p.hid_p,   # 2*M*D*(2H) up + 2*M*H*D down
            transcendentals=M_p * p.hid_p,       # sigmoid
            bytes_accessed=bytes_accessed,
        ),
    )(x2d, p.w13, p.w2)

    return out2d[:M, :dim].reshape(x.shape)


# --------------------------------------------------------------------------- #
# Module helpers / reference / tests
# --------------------------------------------------------------------------- #
def compute_hidden_dim(hidden_dim, multiple_of, ffn_dim_multiplier=None):
    hidden_dim = int(2 * hidden_dim / 3)
    if ffn_dim_multiplier is not None:
        hidden_dim = int(ffn_dim_multiplier * hidden_dim)
    hidden_dim = multiple_of * ((hidden_dim + multiple_of - 1) // multiple_of)
    return hidden_dim


def xavier_uniform(key, fan_out, fan_in, dtype=jnp.float32):
    # torch xavier_uniform_ on a (fan_out, fan_in) weight.
    limit = math.sqrt(6.0 / (fan_in + fan_out))
    return jax.random.uniform(key, (fan_out, fan_in), dtype=dtype,
                              minval=-limit, maxval=limit)


def _reference(x, w1, w3, w2, *, compute_dtype=jnp.bfloat16):
    """Pure-JAX reference matching the kernel's compute dtype semantics."""
    dim = x.shape[-1]
    xc = x.reshape(-1, dim).astype(compute_dtype)
    h1 = jnp.dot(xc, w1.astype(compute_dtype), preferred_element_type=jnp.float32)
    h3 = jnp.dot(xc, w3.astype(compute_dtype), preferred_element_type=jnp.float32)
    gated = (h1 * jax.nn.sigmoid(h1)) * h3
    out = jnp.dot(gated.astype(compute_dtype), w2.astype(compute_dtype),
                  preferred_element_type=jnp.float32)
    return out.astype(x.dtype).reshape(x.shape)


if __name__ == "__main__":
    # TODO(synk): ColumnParallelLinear/RowParallelLinear tensor-parallel sharding
    # is not replicated; this is the single-device (world_size=1) forward pass.

    # --- Test 1: module-consistent small shapes, f32 compute path ------------
    # Exercises the zero-padding path (dim 32 -> 128, hidden 96 -> 128) with a
    # tight f32 tolerance.
    dim = 32
    hidden = compute_hidden_dim(128, 32, None)   # -> 96
    batch, seq = 2, 8
    key = jax.random.PRNGKey(0)
    k_x, k1, k2, k3 = jax.random.split(key, 4)

    x = jax.random.normal(k_x, (batch, seq, dim), dtype=jnp.float32)
    # torch Linear weights are (out_features, in_features); transpose so the
    # kernel does y = x @ W directly.
    w1 = xavier_uniform(k1, hidden, dim).T   # [dim, hidden]
    w3 = xavier_uniform(k3, hidden, dim).T   # [dim, hidden]
    w2 = xavier_uniform(k2, dim, hidden).T   # [hidden, dim]

    ff = make_feed_forward(w1, w3, w2, compute_dtype=jnp.float32)
    out = jax.block_until_ready(ff(x))
    ref = _reference(x, w1, w3, w2, compute_dtype=jnp.float32)
    assert out.shape == x.shape and out.dtype == x.dtype
    assert jnp.allclose(out, ref, atol=1e-4, rtol=1e-4), "mismatch (test 1)"

    # --- Test 2: default bf16 MXU path, tiled grid ----------------------------
    # M = 272 -> 3 ragged row tiles (tm=96), hidden 256 -> 2 chunks of th=128,
    # exercising the hidden-axis accumulator and adaptive row tiling.
    dim2, hidden2, batch2, seq2 = 128, 256, 2, 136
    k_x2, k4, k5, k6 = jax.random.split(jax.random.PRNGKey(0), 4)
    x2 = jax.random.normal(k_x2, (batch2, seq2, dim2), dtype=jnp.float32)
    w1b = xavier_uniform(k4, hidden2, dim2).T
    w3b = xavier_uniform(k5, hidden2, dim2).T
    w2b = xavier_uniform(k6, dim2, hidden2).T

    ff2 = make_feed_forward(w1b, w3b, w2b, tm_max=128, th_max=128)  # bf16 default
    out2 = jax.block_until_ready(ff2(x2))
    ref2 = _reference(x2, w1b, w3b, w2b, compute_dtype=jnp.bfloat16)
    assert jnp.allclose(out2, ref2, atol=5e-3, rtol=5e-3), "mismatch (test 2)"

    print("KERNEL_OK")
</pallas_src>

<mosaic_0001>
module attributes {stable_mosaic.version = 11 : i64} {
  func.func @_ffn_kernel(%arg0: i32, %arg1: i32, %arg2: memref<16x128xf32, #tpu.memory_space<vmem>>, %arg3: memref<128x256xf32, #tpu.memory_space<vmem>>, %arg4: memref<128x128xf32, #tpu.memory_space<vmem>>, %arg5: memref<16x128xf32, #tpu.memory_space<vmem>>, %arg6: memref<16x128xf32, #tpu.memory_space<vmem>>) attributes {dimension_semantics = [#tpu.dimension_semantics<parallel>, #tpu.dimension_semantics<arbitrary>], iteration_bounds = array<i64: 1, 1>, scalar_prefetch = 0 : i64, scratch_operands = 1 : i64, tpu.core_type = #tpu.core_type<tc>, window_params = [{transform_indices = @transform_0, window_bounds = array<i64: 16, 128>}, {transform_indices = @transform_1, window_bounds = array<i64: 128, 256>}, {transform_indices = @transform_2, window_bounds = array<i64: 128, 128>}, {transform_indices = @transform_3, window_bounds = array<i64: 16, 128>}]} {
    %c0_i32 = arith.constant 0 : i32
    %0 = arith.cmpi eq, %arg1, %c0_i32 : i32
    %1 = arith.extui %0 : i1 to i32
    %c0_i32_0 = arith.constant 0 : i32
    %2 = arith.cmpi ne, %1, %c0_i32_0 : i32
    scf.if %2 {
      %cst_14 = arith.constant 0.000000e+00 : f32
      %23 = vector.broadcast %cst_14 : f32 to vector<16x128xf32>
      %c0_15 = arith.constant 0 : index
      %c0_16 = arith.constant 0 : index
      %24 = vector.load %arg6[%c0_15, %c0_16] : memref<16x128xf32, #tpu.memory_space<vmem>>, vector<16x128xf32>
      tpu.vector_store %arg6[%c0_15, %c0_16], %23 {strides = array<i32>} : memref<16x128xf32, #tpu.memory_space<vmem>>, vector<16x128xf32>,
    } else {
    }
    %c0 = arith.constant 0 : index
    %c0_1 = arith.constant 0 : index
    %3 = vector.load %arg2[%c0, %c0_1] : memref<16x128xf32, #tpu.memory_space<vmem>>, vector<16x128xf32>
    %c0_2 = arith.constant 0 : index
    %c0_3 = arith.constant 0 : index
    %4 = vector.load %arg3[%c0_2, %c0_3] : memref<128x256xf32, #tpu.memory_space<vmem>>, vector<128x256xf32>
    %cst = arith.constant dense<0.000000e+00> : vector<16x256xf32>
    %5 = tpu.matmul %3, %4, %cst {dimension_numbers = #tpu.dot_dimension_numbers<[1], [0], [0], [1], [0, 0, 1, 1], [], []>} : vector<16x128xf32>, vector<128x256xf32>, vector<16x256xf32> -> vector<16x256xf32>
    %6 = vector.extract_strided_slice %5 {offsets = [0, 0], sizes = [16, 128], strides = [1, 1]} : vector<16x256xf32> to vector<16x128xf32>
    %7 = vector.extract_strided_slice %5 {offsets = [0, 128], sizes = [16, 128], strides = [1, 1]} : vector<16x256xf32> to vector<16x128xf32>
    %8 = arith.negf %6 : vector<16x128xf32>
    %9 = math.exp %8 : vector<16x128xf32>
    %cst_4 = arith.constant 1.000000e+00 : f32
    %10 = vector.broadcast %cst_4 : f32 to vector<16x128xf32>
    %11 = arith.addf %10, %9 : vector<16x128xf32>
    %12 = arith.divf %10, %11 : vector<16x128xf32>
    %13 = arith.mulf %6, %12 : vector<16x128xf32>
    %14 = arith.mulf %13, %7 : vector<16x128xf32>
    %c0_5 = arith.constant 0 : index
    %c0_6 = arith.constant 0 : index
    %15 = vector.load %arg6[%c0_5, %c0_6] : memref<16x128xf32, #tpu.memory_space<vmem>>, vector<16x128xf32>
    %c0_7 = arith.constant 0 : index
    %c0_8 = arith.constant 0 : index
    %16 = vector.load %arg4[%c0_7, %c0_8] : memref<128x128xf32, #tpu.memory_space<vmem>>, vector<128x128xf32>
    %cst_9 = arith.constant dense<0.000000e+00> : vector<16x128xf32>
    %17 = tpu.matmul %14, %16, %cst_9 {dimension_numbers = #tpu.dot_dimension_numbers<[1], [0], [0], [1], [0, 0, 1, 1], [], []>} : vector<16x128xf32>, vector<128x128xf32>, vector<16x128xf32> -> vector<16x128xf32>
    %18 = arith.addf %15, %17 : vector<16x128xf32>
    %c0_10 = arith.constant 0 : index
    %c0_11 = arith.constant 0 : index
    %19 = vector.load %arg6[%c0_10, %c0_11] : memref<16x128xf32, #tpu.memory_space<vmem>>, vector<16x128xf32>
    tpu.vector_store %arg6[%c0_10, %c0_11], %18 {strides = array<i32>} : memref<16x128xf32, #tpu.memory_space<vmem>>, vector<16x128xf32>,
    %c0_i32_12 = arith.constant 0 : i32
    %20 = arith.cmpi eq, %arg1, %c0_i32_12 : i32
    %21 = arith.extui %20 : i1 to i32
    %c0_i32_13 = arith.constant 0 : i32
    %22 = arith.cmpi ne, %21, %c0_i32_13 : i32
    scf.if %22 {
      %c0_14 = arith.constant 0 : index
      %c0_15 = arith.constant 0 : index
      %23 = vector.load %arg6[%c0_14, %c0_15] : memref<16x128xf32, #tpu.memory_space<vmem>>, vector<16x128xf32>
      %c0_16 = arith.constant 0 : index
      %c0_17 = arith.constant 0 : index
      %24 = vector.load %arg5[%c0_16, %c0_17] : memref<16x128xf32, #tpu.memory_space<vmem>>, vector<16x128xf32>
      tpu.vector_store %arg5[%c0_16, %c0_17], %23 {strides = array<i32>} : memref<16x128xf32, #tpu.memory_space<vmem>>, vector<16x128xf32>,
    } else {
    }
    return
  }
  func.func @transform_0(%arg0: i32, %arg1: i32) -> (i32, i32) {
    %c0_i32 = arith.constant 0 : i32
    %c0_i32_0 = arith.constant 0 : i32
    return %arg0, %c0_i32 : i32, i32
  }
  func.func @transform_1(%arg0: i32, %arg1: i32) -> (i32, i32) {
    %c0_i32 = arith.constant 0 : i32
    %c0_i32_0 = arith.constant 0 : i32
    return %c0_i32, %arg1 : i32, i32
  }
  func.func @transform_2(%arg0: i32, %arg1: i32) -> (i32, i32) {
    %c0_i32 = arith.constant 0 : i32
    %c0_i32_0 = arith.constant 0 : i32
    return %arg1, %c0_i32 : i32, i32
  }
  func.func @transform_3(%arg0: i32, %arg1: i32) -> (i32, i32) {
    %c0_i32 = arith.constant 0 : i32
    %c0_i32_0 = arith.constant 0 : i32
    return %arg0, %c0_i32 : i32, i32
  }
}

</mosaic_0001>

<bundles_post_ra>
// kernel: tpu_custom_call.1
= control target key start
LH: loop header
LB: loop body
LE: loop exit
PB: predicated region body
PF: predicated region fallthrough
CT: control target
= control target key end

     0   :  { %8 = vsyncpa [#allocation4], 0  ;;  %s521_s0 = inlined_call_operand.hbm [shape: f32[16,128], index: 0, kind: input, shape index: {}]   ;;  %s522_s1 = inlined_call_operand.hbm [shape: f32[128,256], index: 1, kind: input, shape index: {}]   ;;  %s523_s2 = inlined_call_operand.hbm [shape: f32[128,128], index: 2, kind: input, shape index: {}]   ;;  %s524_s3 = inlined_call_operand.hbm [shape: f32[16,128], index: 3, kind: output, shape index: {}]  }
   0x1   :  { %9 = vsyncpa [#allocation7], 0 }
   0x2   :  { %10 = vsyncpa [#allocation5], 0  ;;  %s469_s12 = smov [#allocation6]  }
   0x3   :  { %s28_s13 = sshll.u32 %s469_s12, 4  ;;  %s29_s13 = int_to_ptr.vmem [resolvable:$true] %s28_s13 }
   0x4   :  { %s391_s14 = scalar_lea.vmem %s29_s13, 4096  ;;  %p396_p1 = scmp.lt.s32.totalorder %s29_s13, %s29_s13 }
   0x5   :  { %p392_p0 = scmp.ne.s32.totalorder %s29_s13, %s391_s14  ;;  %p397_p2 = scmp.lt.s32.totalorder %s391_s14, %s391_s14 }
   0x7   :  { %p398_p3 = por %p397_p2, %p396_p1 }
   0x9   :  { %p399_p4 = pnand %p398_p3, %p392_p0 }
   0xb   :  { %402 = shalt.err (!%p399_p4)
}
   0xc   :  { %s470_s15 = smov 256   ;;  %s471_s16 = smov 16  }
   0xd   :  { %34 = dma.hbm_to_vmem [thread:$0]  %s522_s1, 4096, %s29_s13, [#allocation7], %s470_s15, %s470_s15, %s471_s16  }
   0xe   :  { %s472_s19 = smov [#allocation3]  }
   0xf   :  { %s16_s20 = sshll.u32 %s472_s19, 4  ;;  %s17_s20 = int_to_ptr.vmem [resolvable:$true] %s16_s20 }
  0x10   :  { %s411_s21 = scalar_lea.vmem %s17_s20, 256  ;;  %p416_p6 = scmp.lt.s32.totalorder %s17_s20, %s17_s20 }
  0x11   :  { %p412_p5 = scmp.ne.s32.totalorder %s17_s20, %s411_s21  ;;  %p417_p7 = scmp.lt.s32.totalorder %s411_s21, %s411_s21 }
  0x13   :  { %p418_p8 = por %p417_p7, %p416_p6 }
  0x15   :  { %p419_p9 = pnand %p418_p8, %p412_p5 }
  0x17   :  { %422 = shalt.err (!%p419_p9)
}
  0x18   :  { %s473_s22 = smov 128   ;;  %s474_s23 = smov 8  }
  0x19   :  { %22 = dma.hbm_to_vmem [thread:$0]  %s521_s0, 256, %s17_s20, [#allocation4], %s473_s22, %s473_s22, %s474_s23  }
  0x1a   :  { %s475_s1 = smov [#allocation8]  }
  0x1b   :  { %s40_s26 = sshll.u32 %s475_s1, 4  ;;  %s41_s26 = int_to_ptr.vmem [resolvable:$true] %s40_s26 }
  0x1c   :  { %s431_s27 = scalar_lea.vmem %s41_s26, 2048  ;;  %p436_p11 = scmp.lt.s32.totalorder %s41_s26, %s41_s26 }
  0x1d   :  { %p432_p10 = scmp.ne.s32.totalorder %s41_s26, %s431_s27  ;;  %p437_p12 = scmp.lt.s32.totalorder %s431_s27, %s431_s27 }
  0x1f   :  { %p438_p13 = por %p437_p12, %p436_p11 }
  0x21   :  { %p439_p0 = pnand %p438_p13, %p432_p10 }
  0x23   :  { %442 = shalt.err (!%p439_p0)
}
  0x24   :  { %46 = dma.hbm_to_vmem [thread:$0]  %s523_s2, 2048, %s41_s26, [#allocation7], %s473_s22, %s473_s22, %s474_s23  }
  0x25   :  { %463 = dma.done.wait [#allocation4], 256  }
  0x26   :  { %464 = vsyncadd [#allocation4], 4294967040 }
  0x27   :  { %465 = dma.done.wait [#allocation7], 6144  }
  0x28   :  { %466 = vsyncadd [#allocation7], 4294961152  ;;  %v476_v0 = vmov 0.0   ;;  %v95_v1 = vld [vmem:[#allocation6 + $0xf8] sm:$0xff]  ;;  %v94_v2 = vld [vmem:[#allocation6 + $0xf0] sm:$0xff]  ;;  %s477_s0 = smov [#allocation9]  }
  0x29   :  { %160 = vmatprep.mubr.f32.mxu0 %v476_v0  ;;  %v93_v3 = vld [vmem:[#allocation6 + $0xe8] sm:$0xff]  ;;  %96 = vmatprep.subr.mxu0 %v95_v1  ;;  %v92_v4 = vld [vmem:[#allocation6 + $0xe0] sm:$0xff]  ;;  %v91_v5 = vld [vmem:[#allocation6 + $0xd8] sm:$0xff]  ;;  %s298_s2 = sshll.u32 %s477_s0, 4  ;;  %s299_s2 = int_to_ptr.vmem [resolvable:$true] %s298_s2 }
  0x2a   :  { %97 = vmatpush1.msra.mxu0 %v94_v2  ;;  %v90_v6 = vld [vmem:[#allocation6 + $0xd0] sm:$0xff]  ;;  %v89_v7 = vld [vmem:[#allocation6 + $0xc8] sm:$0xff]  ;;  %v88_v8 = vld [vmem:[#allocation6 + $0xc0] sm:$0xff]  ;;  %s443_s30 = scalar_lea.vmem %s299_s2, 256  ;;  %p448_p2 = scmp.lt.s32.totalorder %s299_s2, %s299_s2 }
  0x2b   :  { %98 = vmatprep.subr.mxu0 %v93_v3  ;;  %v87_v9 = vld [vmem:[#allocation6 + $0xb8] sm:$0xff]  ;;  %v86_v10 = vld [vmem:[#allocation6 + $0xb0] sm:$0xff]  ;;  %v85_v11 = vld [vmem:[#allocation6 + $0xa8] sm:$0xff]  ;;  %p444_p1 = scmp.ne.s32.totalorder %s299_s2, %s443_s30  ;;  %p449_p3 = scmp.lt.s32.totalorder %s443_s30, %s443_s30 }
  0x2c   :  { %99 = vmatpush1.msra.mxu0 %v92_v4  ;;  %v84_v12 = vld [vmem:[#allocation6 + $0xa0] sm:$0xff]  ;;  %v83_v13 = vld [vmem:[#allocation6 + $0x98] sm:$0xff]  ;;  %v82_v14 = vld [vmem:[#allocation6 + $0x90] sm:$0xff] }
  0x2d   :  { %100 = vmatprep.subr.mxu0 %v91_v5  ;;  %v81_v15 = vld [vmem:[#allocation6 + $0x88] sm:$0xff]  ;;  %v80_v16 = vld [vmem:[#allocation6 + $0x80] sm:$0xff]  ;;  %v79_v17 = vld [vmem:[#allocation6 + $0x78] sm:$0xff]  ;;  %p450_p4 = por %p449_p3, %p448_p2 }
  0x2e   :  { %101 = vmatpush1.msra.mxu0 %v90_v6  ;;  %v78_v18 = vld [vmem:[#allocation6 + $0x70] sm:$0xff]  ;;  %v77_v19 = vld [vmem:[#allocation6 + $0x68] sm:$0xff]  ;;  %v76_v20 = vld [vmem:[#allocation6 + $0x60] sm:$0xff] }
  0x2f   :  { %102 = vmatprep.subr.mxu0 %v89_v7  ;;  %v75_v21 = vld [vmem:[#allocation6 + $0x58] sm:$0xff]  ;;  %v74_v22 = vld [vmem:[#allocation6 + $0x50] sm:$0xff]  ;;  %v73_v23 = vld [vmem:[#allocation6 + $0x48] sm:$0xff]  ;;  %p451_p5 = pnand %p450_p4, %p444_p1 }
  0x30   :  { %103 = vmatpush1.msra.mxu0 %v88_v8  ;;  %v72_v24 = vld [vmem:[#allocation6 + $0x40] sm:$0xff]  ;;  %v71_v25 = vld [vmem:[#allocation6 + $0x38] sm:$0xff]  ;;  %v70_v26 = vld [vmem:[#allocation6 + $0x30] sm:$0xff] }
  0x31   :  { %104 = vmatprep.subr.mxu0 %v87_v9  ;;  %v69_v27 = vld [vmem:[#allocation6 + $0x28] sm:$0xff]  ;;  %v68_v28 = vld [vmem:[#allocation6 + $0x20] sm:$0xff]  ;;  %v67_v29 = vld [vmem:[#allocation6 + $0x18] sm:$0xff] }
  0x32   :  { %105 = vmatpush1.msra.mxu0 %v86_v10  ;;  %v66_v30 = vld [vmem:[#allocation6 + $0x10] sm:$0xff]  ;;  %v65_v31 = vld [vmem:[#allocation6 + $0x8] sm:$0xff]  ;;  %v64_v32 = vld [vmem:[#allocation6] sm:$0xff] }
  0x33   :  { %106 = vmatprep.subr.mxu0 %v85_v11  ;;  %v62_v33 = vld [vmem:[#allocation3] sm:$0xff]  ;;  %v63_v34 = vld [vmem:[#allocation3 + $0x8] sm:$0xff]  ;;  %v204_v37 = vld [vmem:[#allocation8 + $0x68] sm:$0xff] }
  0x34   :  { %107 = vmatpush1.msra.mxu0 %v84_v12  ;;  %v206_v35 = vld [vmem:[#allocation8 + $0x78] sm:$0xff]  ;;  %v205_v36 = vld [vmem:[#allocation8 + $0x70] sm:$0xff]  ;;  %v203_v38 = vld [vmem:[#allocation8 + $0x60] sm:$0xff] }
  0x35   :  { %108 = vmatprep.subr.mxu0 %v83_v13  ;;  %331 = vmatprep.subr.mxu1 %v206_v35  ;;  %v202_v39 = vld [vmem:[#allocation8 + $0x58] sm:$0xff]  ;;  %v201_v40 = vld [vmem:[#allocation8 + $0x50] sm:$0xff]  ;;  %v200_v41 = vld [vmem:[#allocation8 + $0x48] sm:$0xff] }
  0x36   :  { %109 = vmatpush1.msra.mxu0 %v82_v14  ;;  %332 = vmatpush3.msra.mxu1 %v206_v35  ;;  %v199_v42 = vld [vmem:[#allocation8 + $0x40] sm:$0xff]  ;;  %v198_v43 = vld [vmem:[#allocation8 + $0x38] sm:$0xff]  ;;  %v197_v44 = vld [vmem:[#allocation8 + $0x30] sm:$0xff] }
  0x37   :  { %110 = vmatprep.subr.mxu0 %v81_v15  ;;  %333 = vmatprep.subr.mxu1 %v205_v36  ;;  %v196_v45 = vld [vmem:[#allocation8 + $0x28] sm:$0xff]  ;;  %v195_v46 = vld [vmem:[#allocation8 + $0x20] sm:$0xff]  ;;  %v194_v47 = vld [vmem:[#allocation8 + $0x18] sm:$0xff] }
  0x38   :  { %111 = vmatpush1.msra.mxu0 %v80_v16  ;;  %334 = vmatpush3.msra.mxu1 %v205_v36  ;;  %v193_v48 = vld [vmem:[#allocation8 + $0x10] sm:$0xff]  ;;  %v192_v49 = vld [vmem:[#allocation8 + $0x8] sm:$0xff]  ;;  %v191_v50 = vld [vmem:[#allocation8] sm:$0xff] }
  0x39   :  { %112 = vmatprep.subr.mxu0 %v79_v17  ;;  %335 = vmatprep.subr.mxu1 %v204_v37 }
  0x3a   :  { %113 = vmatpush1.msra.mxu0 %v78_v18  ;;  %336 = vmatpush3.msra.mxu1 %v204_v37 }
  0x3b   :  { %114 = vmatprep.subr.mxu0 %v77_v19  ;;  %337 = vmatprep.subr.mxu1 %v203_v38 }
  0x3c   :  { %115 = vmatpush1.msra.mxu0 %v76_v20  ;;  %338 = vmatpush3.msra.mxu1 %v203_v38 }
  0x3d   :  { %116 = vmatprep.subr.mxu0 %v75_v21  ;;  %339 = vmatprep.subr.mxu1 %v202_v39 }
  0x3e   :  { %117 = vmatpush1.msra.mxu0 %v74_v22  ;;  %340 = vmatpush3.msra.mxu1 %v202_v39 }
  0x3f   :  { %118 = vmatprep.subr.mxu0 %v73_v23  ;;  %341 = vmatprep.subr.mxu1 %v201_v40 }
  0x40   :  { %119 = vmatpush1.msra.mxu0 %v72_v24  ;;  %342 = vmatpush3.msra.mxu1 %v201_v40 }
  0x41   :  { %120 = vmatprep.subr.mxu0 %v71_v25  ;;  %343 = vmatprep.subr.mxu1 %v200_v41 }
  0x42   :  { %121 = vmatpush1.msra.mxu0 %v70_v26  ;;  %344 = vmatpush3.msra.mxu1 %v200_v41 }
  0x43   :  { %122 = vmatprep.subr.mxu0 %v69_v27  ;;  %345 = vmatprep.subr.mxu1 %v199_v42 }
  0x44   :  { %123 = vmatpush1.msra.mxu0 %v68_v28  ;;  %346 = vmatpush3.msra.mxu1 %v199_v42 }
  0x45   :  { %124 = vmatprep.subr.mxu0 %v67_v29  ;;  %347 = vmatprep.subr.mxu1 %v198_v43 }
  0x46   :  { %125 = vmatpush1.msra.mxu0 %v66_v30  ;;  %348 = vmatpush3.msra.mxu1 %v198_v43 }
  0x47   :  { %126 = vmatprep.subr.mxu0 %v65_v31  ;;  %349 = vmatprep.subr.mxu1 %v197_v44 }
  0x48   :  { %127 = vmatpush1.msra.mxu0 %v64_v32  ;;  %350 = vmatpush3.msra.mxu1 %v197_v44 }
  0x49   :  { %161 = vmatmul.mubr.f32.vlgmr.msra.gmra.mxu0 %v62_v33  ;;  %351 = vmatprep.subr.mxu1 %v196_v45 }
  0x4a   :  { %166 = vmatprep.mubr.f32.mxu0 %v476_v0  ;;  %352 = vmatpush3.msra.mxu1 %v196_v45 }
  0x4b   :  { %353 = vmatprep.subr.mxu1 %v195_v46 }
  0x4c   :  { %354 = vmatpush3.msra.mxu1 %v195_v46 }
  0x4d   :  { %167 = vmatmul.mubr.f32.gmra.mxu0 %v63_v34  ;;  %355 = vmatprep.subr.mxu1 %v194_v47 }
  0x4e   :  { %356 = vmatpush3.msra.mxu1 %v194_v47 }
  0x4f   :  { %357 = vmatprep.subr.mxu1 %v193_v48 }
  0x50   :  { %358 = vmatpush3.msra.mxu1 %v193_v48 }
  0x51   :  { %359 = vmatprep.subr.mxu1 %v192_v49 }
  0x52   :  { %360 = vmatpush3.msra.mxu1 %v192_v49 }
  0x53   :  { %361 = vmatprep.subr.mxu1 %v191_v50 }
  0x54   :  { %362 = vmatpush3.msra.mxu1 %v191_v50 }
 0x109   :  { %v162_v51 = vpop.f32.mrf.mxu0 }
 0x10a   :  { %v311_v52 = vmul.f32 -1.442695, %v162_v51 }
 0x10b   :  { %v164_v53 = vpop.f32.mrf.mxu0 }
 0x10c   :  { %375 = vpow2.f32 %v311_v52 }
 0x10d   :  { %v168_v54 = vpop.f32.mrf.mxu0 }
 0x10e   :  { %v312_v55 = vmul.f32 -1.442695, %v168_v54 }
 0x10f   :  { %v170_v1 = vpop.f32.mrf.mxu0 }
 0x110   :  { %377 = vpow2.f32 %v312_v55 }
 0x119   :  { %v376_v56 = vpop.eup %375 }
 0x11a   :  { %v179_v57 = vadd.f32 1.0, %v376_v56 }
 0x11c   :  { %379 = vrcp.f32 %v179_v57 }
 0x11d   :  { %v378_v58 = vpop.eup %377 }
 0x11e   :  { %v180_v59 = vadd.f32 1.0, %v378_v58 }
 0x120   :  { %381 = vrcp.f32 %v180_v59 }
 0x129   :  { %v380_v60 = vpop.eup %379 }
 0x12a   :  { %v185_v61 = vmul.f32 %v380_v60, %v162_v51 }
 0x12c   :  { %v187_v62 = vmul.f32 %v185_v61, %v164_v53 }
 0x12d   :  { %v382_v63 = vpop.eup %381 }
 0x12e   :  { %v186_v0 = vmul.f32 %v382_v63, %v168_v54  ;;  %363 = vmatprep.mubr.f32.mxu1 %v187_v62 }
 0x130   :  { %v188_v2 = vmul.f32 %v186_v0, %v170_v1 }
 0x132   :  { %364 = vmatmul.mubr.f32.vlgmr.msra.gmra.mxu1 %v188_v2 }
 0x1f2   :  { %v365_v3 = vpop.f32.mrf.mxu1 }
 0x1f3   :  { %292 = vst [vmem:[#allocation9 + $0x8] sm:$0xff] %v365_v3 }
 0x1f4   :  { %v273_v4 = vpop.f32.mrf.mxu1 }
 0x1f5   :  { %291 = vst [vmem:[#allocation9] sm:$0xff] %v273_v4 }
 0x1f6   :  { %454 = shalt.err (!%p451_p5)
}
 0x1f7   :  { %304 = dma.vmem_to_hbm [thread:$0]  %s299_s2, 256, %s524_s3, [#allocation5], %s473_s22, %s473_s22, %s474_s23  }
 0x1f8   :  { %467 = dma.done.wait [#allocation5], 256  }
 0x1f9   :  { %468 = vsyncadd [#allocation5], 4294967040 }
 0x1fa   :  { %308 = vsyncpa [#allocation4], 1 }
 0x1fb   :  { %309 = vsyncpa [#allocation7], 1 }
 0x1fc   :  { %310 = vsyncpa [#allocation5], 1 }

</bundles_post_ra>
